<compile_context>
chip_gen: v6e
topology: v6e:2x2x1
jax: 0.10.0
libtpu: 0.0.40
codegen_flags: <defaults>
</compile_context>

<pallas_src>
import jax
import jax.numpy as jnp
from jax.experimental import pallas as pl
from jax.experimental.pallas import tpu as pltpu


def _round_up(x, m):
    return -(-x // m) * m


def _gen_prob_kernel(enc_ref, dec_ref, we_ref, wd_ref, bias_ref, o_ref):
    # enc_ref: (TB, He) native dtype, dec_ref: (TB, Hd) native dtype
    # we_ref : (1, He) f32, wd_ref: (1, Hd) f32   (sublane-padded rows only)
    # bias_ref: (1, 1) f32 in SMEM (b_enc + b_dec folded)
    # VPU multiply + lane (XLU) reduce in f32; avoids the lane-padded (H, 1)
    # weight layout and an N=1 MXU matmul.
    e = jnp.sum(enc_ref[...].astype(jnp.float32) * we_ref[...],
                axis=-1, keepdims=True)                       # (TB, 1)
    d = jnp.sum(dec_ref[...].astype(jnp.float32) * wd_ref[...],
                axis=-1, keepdims=True)                       # (TB, 1)
    s = e + d + bias_ref[0, 0]
    o_ref[...] = jax.nn.sigmoid(s).astype(o_ref.dtype)


def generator_probability(enc_context, dec, w_enc, b_enc, w_dec, b_dec, *,
                          block_b=2048, target_step_bytes=2 << 20,
                          min_grid_steps=4):
    """enc_context: (B, He), dec: (B, Hd), w_enc: (He, 1), w_dec: (Hd, 1),
    b_enc / b_dec: scalars.  Returns (B,) f32 sigmoid gate probabilities."""
    B, He = enc_context.shape
    B2, Hd = dec.shape
    assert B == B2, "enc_context and dec must share the batch dimension"

    in_dtype = enc_context.dtype
    if dec.dtype != in_dtype:
        dec = dec.astype(in_dtype)          # tiny relative to the main read
    itemsize = jnp.dtype(in_dtype).itemsize
    sublane = {4: 8, 2: 16, 1: 32}.get(itemsize, 8)

    # Weights as (1, H) rows (sublane-padded x8, not lane-padded x128) + folded bias.
    w_enc_row = jnp.asarray(w_enc, jnp.float32).reshape(1, He)
    w_dec_row = jnp.asarray(w_dec, jnp.float32).reshape(1, Hd)
    bias = (jnp.asarray(b_enc, jnp.float32)
            + jnp.asarray(b_dec, jnp.float32)).reshape(1, 1)

    # --- batch tile: ~target_step_bytes of streamed input per grid step ---
    row_bytes = max(1, (He + Hd) * itemsize)
    tb = max(sublane, target_step_bytes // row_bytes)
    # Keep >= min_grid_steps steps when B allows it (v7x: both TCs pull HBM).
    if B >= min_grid_steps * sublane:
        tb = min(tb, _round_up(pl.cdiv(B, min_grid_steps), sublane))
    tb = min(tb, block_b)
    if tb >= B:
        tb = B                              # single block == full array dim (always legal)
    else:
        tb = (tb // sublane) * sublane      # aligned blocks, ragged last block is masked
    grid_steps = pl.cdiv(B, tb)

    # --- explicit VMEM budget: 2 inputs x 2 buffers x (tb x H) + weights + out ---
    vmem_needed = (2 * tb * (He + Hd) * itemsize
                   + 2 * 8 * (_round_up(He, 128) + _round_up(Hd, 128)) * 4
                   + 2 * tb * 128 * 4
                   + (2 << 20))
    vmem_limit = int(min(max(vmem_needed, 16 << 20), 48 << 20))

    cost = pl.CostEstimate(
        flops=2 * B * (He + Hd),
        transcendentals=B,
        bytes_accessed=B * (He + Hd) * itemsize + B * 4 + (He + Hd) * 4,
    )

    out = pl.pallas_call(
        _gen_prob_kernel,
        out_shape=jax.ShapeDtypeStruct((B, 1), jnp.float32),
        grid_spec=pltpu.PrefetchScalarGridSpec(
            num_scalar_prefetch=0,
            grid=(grid_steps,),
            in_specs=[
                pl.BlockSpec((tb, He), lambda i: (i, 0)),   # streamed over batch
                pl.BlockSpec((tb, Hd), lambda i: (i, 0)),   # streamed over batch
                pl.BlockSpec((1, He), lambda i: (0, 0)),    # resident weight row
                pl.BlockSpec((1, Hd), lambda i: (0, 0)),    # resident weight row
                pl.BlockSpec(memory_space=pltpu.MemorySpace.SMEM),  # folded bias
            ],
            out_specs=pl.BlockSpec((tb, 1), lambda i: (i, 0)),
        ),
        compiler_params=pltpu.CompilerParams(
            dimension_semantics=("parallel",),
            vmem_limit_bytes=vmem_limit),
        cost_estimate=cost,
    )(enc_context, dec, w_enc_row, w_dec_row, bias)

    return out[:, 0]


def init_params(key, enc_hidden, dec_hidden):
    """Matches the PyTorch module:
      - weights: xavier_normal_  (std = sqrt(2 / (fan_in + fan_out)), fan_out=1)
      - biases : default Linear init, U(-1/sqrt(fan_in), 1/sqrt(fan_in))."""
    k1, k2, k3, k4 = jax.random.split(key, 4)
    std_e = (2.0 / (enc_hidden + 1)) ** 0.5
    std_d = (2.0 / (dec_hidden + 1)) ** 0.5
    w_enc = (std_e * jax.random.normal(k1, (enc_hidden, 1))).astype(jnp.float32)
    w_dec = (std_d * jax.random.normal(k2, (dec_hidden, 1))).astype(jnp.float32)
    b_enc = jax.random.uniform(k3, (), minval=-1.0, maxval=1.0) / (enc_hidden ** 0.5)
    b_dec = jax.random.uniform(k4, (), minval=-1.0, maxval=1.0) / (dec_hidden ** 0.5)
    return w_enc, jnp.float32(b_enc), w_dec, jnp.float32(b_dec)


if __name__ == "__main__":
    key = jax.random.PRNGKey(0)

    # --- small demo shapes consistent with the module ---
    B, enc_hidden, dec_hidden = 8, 32, 32
    kx, kd, kp = jax.random.split(key, 3)
    enc_context = jax.random.normal(kx, (B, enc_hidden), dtype=jnp.float32)
    dec = jax.random.normal(kd, (B, dec_hidden), dtype=jnp.float32)
    w_enc, b_enc, w_dec, b_dec = init_params(kp, enc_hidden, dec_hidden)

    p = generator_probability(enc_context, dec, w_enc, b_enc, w_dec, b_dec)
    p = jax.block_until_ready(p)
    ref = jax.nn.sigmoid((enc_context @ w_enc).squeeze(-1) + b_enc
                         + (dec @ w_dec).squeeze(-1) + b_dec)
    assert p.shape == (B,)
    assert jnp.allclose(p, ref, atol=1e-6), (p, ref)

    # --- ragged grid check: B not a multiple of tb, uneven hidden sizes ---
    B2, He2, Hd2 = 37, 48, 80
    k1, k2, k3 = jax.random.split(jax.random.PRNGKey(1), 3)
    ec2 = jax.random.normal(k1, (B2, He2), dtype=jnp.float32)
    dc2 = jax.random.normal(k2, (B2, Hd2), dtype=jnp.float32)
    we2, be2, wd2, bd2 = init_params(k3, He2, Hd2)
    p2 = jax.block_until_ready(generator_probability(ec2, dc2, we2, be2, wd2, bd2))
    ref2 = jax.nn.sigmoid((ec2 @ we2).squeeze(-1) + be2
                          + (dc2 @ wd2).squeeze(-1) + bd2)
    assert p2.shape == (B2,)
    assert jnp.allclose(p2, ref2, atol=1e-5), (p2, ref2)

    # --- bf16 activations: no wrapper upcast, f32 accumulation in-kernel ---
    p3 = jax.block_until_ready(generator_probability(
        ec2.astype(jnp.bfloat16), dc2.astype(jnp.bfloat16), we2, be2, wd2, bd2))
    assert jnp.allclose(p3, ref2, atol=2e-2), (p3, ref2)

    print("KERNEL_OK")
</pallas_src>

<mosaic_0001>
module attributes {stable_mosaic.version = 11 : i64} {
  func.func @_gen_prob_kernel(%arg0: i32, %arg1: memref<8x32xf32, #tpu.memory_space<vmem>>, %arg2: memref<8x32xf32, #tpu.memory_space<vmem>>, %arg3: memref<1x32xf32, #tpu.memory_space<vmem>>, %arg4: memref<1x32xf32, #tpu.memory_space<vmem>>, %arg5: memref<1x1xf32, #tpu.memory_space<smem>>, %arg6: memref<8x1xf32, #tpu.memory_space<vmem>>) attributes {dimension_semantics = [#tpu.dimension_semantics<parallel>], iteration_bounds = array<i64: 1>, scalar_prefetch = 0 : i64, scratch_operands = 0 : i64, tpu.core_type = #tpu.core_type<tc>, window_params = [{transform_indices = @transform_0, window_bounds = array<i64: 8, 32>}, {transform_indices = @transform_1, window_bounds = array<i64: 8, 32>}, {pipeline_mode = #tpu.pipeline_mode<synchronous>, transform_indices = @transform_2, window_bounds = array<i64: 1, 32>}, {pipeline_mode = #tpu.pipeline_mode<synchronous>, transform_indices = @transform_3, window_bounds = array<i64: 1, 32>}, {transform_indices = @transform_4, window_bounds = array<i64: 1, 1>}, {transform_indices = @transform_5, window_bounds = array<i64: 8, 1>}]} {
    %c0 = arith.constant 0 : index
    %c0_0 = arith.constant 0 : index
    %0 = vector.load %arg1[%c0, %c0_0] : memref<8x32xf32, #tpu.memory_space<vmem>>, vector<8x32xf32>
    %c0_1 = arith.constant 0 : index
    %c0_2 = arith.constant 0 : index
    %1 = vector.load %arg3[%c0_1, %c0_2] : memref<1x32xf32, #tpu.memory_space<vmem>>, vector<1x32xf32>
    %2 = vector.broadcast %1 : vector<1x32xf32> to vector<8x32xf32>
    %3 = arith.mulf %0, %2 : vector<8x32xf32>
    %cst = arith.constant dense<0.000000e+00> : vector<8xf32>
    %4 = vector.multi_reduction <add>, %3, %cst [1] : vector<8x32xf32> to vector<8xf32>
    %5 = vector.shape_cast %4 : vector<8xf32> to vector<8x1xf32>
    %c0_3 = arith.constant 0 : index
    %c0_4 = arith.constant 0 : index
    %6 = vector.load %arg2[%c0_3, %c0_4] : memref<8x32xf32, #tpu.memory_space<vmem>>, vector<8x32xf32>
    %c0_5 = arith.constant 0 : index
    %c0_6 = arith.constant 0 : index
    %7 = vector.load %arg4[%c0_5, %c0_6] : memref<1x32xf32, #tpu.memory_space<vmem>>, vector<1x32xf32>
    %8 = vector.broadcast %7 : vector<1x32xf32> to vector<8x32xf32>
    %9 = arith.mulf %6, %8 : vector<8x32xf32>
    %cst_7 = arith.constant dense<0.000000e+00> : vector<8xf32>
    %10 = vector.multi_reduction <add>, %9, %cst_7 [1] : vector<8x32xf32> to vector<8xf32>
    %11 = vector.shape_cast %10 : vector<8xf32> to vector<8x1xf32>
    %12 = arith.addf %5, %11 : vector<8x1xf32>
    %c0_8 = arith.constant 0 : index
    %c0_9 = arith.constant 0 : index
    %13 = memref.load %arg5[%c0_8, %c0_9] : memref<1x1xf32, #tpu.memory_space<smem>>
    %14 = vector.broadcast %13 : f32 to vector<8x1xf32>
    %15 = arith.addf %12, %14 : vector<8x1xf32>
    %16 = arith.negf %15 : vector<8x1xf32>
    %17 = math.exp %16 : vector<8x1xf32>
    %cst_10 = arith.constant 1.000000e+00 : f32
    %18 = vector.broadcast %cst_10 : f32 to vector<8x1xf32>
    %19 = arith.addf %18, %17 : vector<8x1xf32>
    %20 = arith.divf %18, %19 : vector<8x1xf32>
    %c0_11 = arith.constant 0 : index
    %c0_12 = arith.constant 0 : index
    %21 = vector.load %arg6[%c0_11, %c0_12] : memref<8x1xf32, #tpu.memory_space<vmem>>, vector<8x1xf32>
    tpu.vector_store %arg6[%c0_11, %c0_12], %20 {strides = array<i32>} : memref<8x1xf32, #tpu.memory_space<vmem>>, vector<8x1xf32>,
    return
  }
  func.func @transform_0(%arg0: i32) -> (i32, i32) {
    %c0_i32 = arith.constant 0 : i32
    %c0_i32_0 = arith.constant 0 : i32
    return %arg0, %c0_i32 : i32, i32
  }
  func.func @transform_1(%arg0: i32) -> (i32, i32) {
    %c0_i32 = arith.constant 0 : i32
    %c0_i32_0 = arith.constant 0 : i32
    return %arg0, %c0_i32 : i32, i32
  }
  func.func @transform_2(%arg0: i32) -> (i32, i32) {
    %c0_i32 = arith.constant 0 : i32
    %c0_i32_0 = arith.constant 0 : i32
    %c0_i32_1 = arith.constant 0 : i32
    return %c0_i32, %c0_i32_0 : i32, i32
  }
  func.func @transform_3(%arg0: i32) -> (i32, i32) {
    %c0_i32 = arith.constant 0 : i32
    %c0_i32_0 = arith.constant 0 : i32
    %c0_i32_1 = arith.constant 0 : i32
    return %c0_i32, %c0_i32_0 : i32, i32
  }
  func.func @transform_4(%arg0: i32) -> (i32, i32) {
    %c0_i32 = arith.constant 0 : i32
    %c0_i32_0 = arith.constant 0 : i32
    %c0_i32_1 = arith.constant 0 : i32
    return %c0_i32, %c0_i32_0 : i32, i32
  }
  func.func @transform_5(%arg0: i32) -> (i32, i32) {
    %c0_i32 = arith.constant 0 : i32
    %c0_i32_0 = arith.constant 0 : i32
    return %arg0, %c0_i32 : i32, i32
  }
}

</mosaic_0001>

<bundles_post_ra>
// kernel: tpu_custom_call.1
= control target key start
LH: loop header
LB: loop body
LE: loop exit
PB: predicated region body
PF: predicated region fallthrough
CT: control target
= control target key end

     0   :  { %11 = vsyncpa [#allocation4], 0  ;;  %s191_s0 = inlined_call_operand.hbm [shape: f32[8,32], index: 0, kind: input, shape index: {}]   ;;  %s192_s1 = inlined_call_operand.hbm [shape: f32[8,32], index: 1, kind: input, shape index: {}]   ;;  %s193_s2 = inlined_call_operand.vmem [shape: f32[1,32], index: 2, kind: input, shape index: {}]   ;;  %s194_s3 = inlined_call_operand.vmem [shape: f32[1,32], index: 3, kind: input, shape index: {}]   ;;  %s195_s4 = inlined_call_operand.<no memory space> [shape: f32[1,1], index: 4, kind: input, shape index: {}]   ;;  %s196_s5 = inlined_call_operand.vmem [shape: f32[8,1], index: 5, kind: output, shape index: {}]  }
   0x1   :  { %12 = vsyncpa [#allocation6], 0  ;;  %s141_s18 = smov [#allocation3]   ;;  %s142_s20 = smov [#allocation5]  }
   0x2   :  { %s19_s19 = sshll.u32 %s141_s18, 4  ;;  %s29_s21 = sshll.u32 %s142_s20, 4  ;;  %s20_s19 = int_to_ptr.vmem [resolvable:$true] %s19_s19  ;;  %s30_s21 = int_to_ptr.vmem [resolvable:$true] %s29_s21 }
   0x3   :  { %s105_s22 = scalar_lea.vmem %s20_s19, 128  ;;  %p110_p1 = scmp.lt.s32.totalorder %s20_s19, %s20_s19 }
   0x4   :  { %p106_p0 = scmp.ne.s32.totalorder %s20_s19, %s105_s22  ;;  %p111_p2 = scmp.lt.s32.totalorder %s105_s22, %s105_s22 }
   0x6   :  { %p112_p3 = por %p111_p2, %p110_p1 }
   0x8   :  { %p113_p4 = pnand %p112_p3, %p106_p0 }
   0xa   :  { %116 = shalt.err (!%p113_p4)
}
   0xb   :  { %22 = dma.hbm_to_vmem [thread:$0]  %s191_s0, 128, %s20_s19, [#allocation4]  }
   0xc   :  { %s125_s25 = scalar_lea.vmem %s30_s21, 128  ;;  %p130_p6 = scmp.lt.s32.totalorder %s30_s21, %s30_s21 }
   0xd   :  { %p126_p5 = scmp.ne.s32.totalorder %s30_s21, %s125_s25  ;;  %p131_p7 = scmp.lt.s32.totalorder %s125_s25, %s125_s25 }
   0xf   :  { %p132_p8 = por %p131_p7, %p130_p6 }
  0x11   :  { %p133_p9 = pnand %p132_p8, %p126_p5 }
  0x13   :  { %136 = shalt.err (!%p133_p9)
}
  0x14   :  { %32 = dma.hbm_to_vmem [thread:$0]  %s192_s1, 128, %s30_s21, [#allocation6]  }
  0x15   :  { %137 = dma.done.wait [#allocation4], 128  }
  0x16   :  { %138 = vsyncadd [#allocation4], 4294967168 }
  0x17   :  { %139 = dma.done.wait [#allocation6], 128  }
  0x18   :  { %140 = vsyncadd [#allocation6], 4294967168  ;;  %v45_v0 = vld [vmem:[#allocation3] sm:$0xff]  ;;  %vm54_vm0 = vcmask 261120   ;;  %v58_v2 = vld [vmem:[#allocation5] sm:$0xff]  ;;  %v72_v9 = vstv %s195_s4  ;;  %vm80_vm1 = vcmask 7168  }
  0x19   :  { %v88_v1 = vld [vmem:[%s193_s2] ss:$0 sm:$0xff] }
  0x1a   :  { %v53_v3 = vmul.f32 %v88_v1, %v45_v0  ;;  %v89_v4 = vld [vmem:[%s194_s3] ss:$0 sm:$0xff] }
  0x1b   :  { %v66_v5 = vmul.f32 %v89_v4, %v58_v2 }
  0x1c   :  { %v55_v6 = vsel %vm54_vm0, %v53_v3, 0.0 }
  0x1d   :  { %56 = vadd.xlane.f32.xlu0 %v55_v6  ;;  %v67_v7 = vsel %vm54_vm0, %v66_v5, 0.0 }
  0x21   :  { %68 = vadd.xlane.f32.xlu0 %v67_v7 }
  0xa6   :  { %v57_v8 = vpop.xlane.xlu0 %56 }
  0xaa   :  { %v69_v10 = vpop.xlane.xlu0 %68 }
  0xab   :  { %v70_v11 = vadd.f32 %v69_v10, %v57_v8 }
  0xad   :  { %v73_v12 = vadd.f32 %v72_v9, %v70_v11 }
  0xaf   :  { %v90_v13 = vmul.f32 -1.442695, %v73_v12 }
  0xb1   :  { %93 = vpow2.f32 %v90_v13 }
  0xbe   :  { %v94_v14 = vpop.eup %93 }
  0xbf   :  { %v77_v15 = vadd.f32 1.0, %v94_v14 }
  0xc1   :  { %95 = vrcp.f32 %v77_v15 }
  0xce   :  { %v96_v16 = vpop.eup %95 }
  0xcf   :  { %81 = vst.msk [vmem:[%s196_s5] sm:$0xff] %vm80_vm1, %v96_v16 }
  0xd0   :  { %86 = vsyncpa [#allocation4], 1 }
  0xd1   :  { %87 = vsyncpa [#allocation6], 1 }

</bundles_post_ra>
